<compile_context>
chip_gen: v7x
topology: tpu7x:2x2x1
jax: 0.10.0
libtpu: 0.0.40
codegen_flags: <defaults>
</compile_context>

<pallas_src>
import jax
import jax.numpy as jnp
from jax.experimental import pallas as pl
from jax.experimental.pallas import tpu as pltpu


_LANE = 128
_VMEM_BUDGET = 20 * 1024 * 1024   # conservative resident-path budget (all gens)


# ---------------------------------------------------------------------------
# Kernel A: resident-weight fast path (no K axis, no accumulator scratch).
# ---------------------------------------------------------------------------
def _vae_head_resident_kernel(x_ref, w_ref, b_ref, eps_ref, mulv_ref, z_ref):
    """Fused heads + reparametrization for one batch tile.

    x_ref:    (TB, D)     f32 flattened features
    w_ref:    (D, 2*HP)   bf16 fused [w_mu|pad | w_logvar|pad] (resident in VMEM)
    b_ref:    (1, 2*HP)   f32 fused bias
    eps_ref:  (TB, HP)    f32 N(0,1) noise (lanes >= L are zero)
    mulv_ref: (TB, 2*HP)  mu at lanes [0:HP], logvar at lanes [HP:2*HP]
    z_ref:    (TB, HP)    z = mu + exp(0.5*logvar) * eps
    """
    hp = eps_ref.shape[-1]
    x = x_ref[...].astype(jnp.bfloat16)
    acc = jnp.dot(x, w_ref[...], preferred_element_type=jnp.float32) + b_ref[...]
    mulv_ref[...] = acc.astype(mulv_ref.dtype)
    mu = acc[:, :hp]
    logvar = acc[:, hp:]
    z_ref[...] = (mu + jnp.exp(0.5 * logvar) * eps_ref[...]).astype(z_ref.dtype)


# ---------------------------------------------------------------------------
# Kernel B: K-tiled fallback for large D (f32 VMEM accumulator).
# ---------------------------------------------------------------------------
def _vae_head_ktiled_kernel(x_ref, w_ref, b_ref, eps_ref, mulv_ref, z_ref,
                            acc_ref):
    k = pl.program_id(1)

    @pl.when(k == 0)
    def _():
        # Bias folded into the accumulator init (saves an epilogue add).
        acc_ref[...] = jnp.broadcast_to(b_ref[...], acc_ref.shape)

    x = x_ref[...].astype(jnp.bfloat16)
    acc_ref[...] += jnp.dot(x, w_ref[...], preferred_element_type=jnp.float32)

    @pl.when(k == pl.num_programs(1) - 1)
    def _():
        hp = eps_ref.shape[-1]
        acc = acc_ref[...]
        mulv_ref[...] = acc.astype(mulv_ref.dtype)
        mu = acc[:, :hp]
        logvar = acc[:, hp:]
        z_ref[...] = (mu + jnp.exp(0.5 * logvar) * eps_ref[...]).astype(z_ref.dtype)


# ---------------------------------------------------------------------------
# Setup-time parameter fusion / lane padding (done once, outside the hot path).
# ---------------------------------------------------------------------------
def prepare_head_params(w_mu, b_mu, w_lv, b_lv):
    """Fuse the two heads and zero-pad each to a 128-lane-dense slot.

    w_mu, w_lv: (D, L) f32; b_mu, b_lv: (L,) f32.
    Returns (w_pad bf16 (D, 2*HP), b_pad f32 (1, 2*HP)); HP = L rounded up to 128.
    """
    d, latent = w_mu.shape
    hp = max(_LANE, pl.cdiv(latent, _LANE) * _LANE)
    w_pad = jnp.zeros((d, 2 * hp), jnp.float32)
    w_pad = w_pad.at[:, :latent].set(w_mu).at[:, hp:hp + latent].set(w_lv)
    b_pad = jnp.zeros((1, 2 * hp), jnp.float32)
    b_pad = b_pad.at[0, :latent].set(b_mu).at[0, hp:hp + latent].set(b_lv)
    return w_pad.astype(jnp.bfloat16), b_pad


def _pick_tk(d):
    """Largest lane-aligned K tile (<= 2048) dividing D; else pad D up to a tile."""
    best = None
    for tk in range(128, min(d, 2048) + 1, 128):
        if d % tk == 0:
            best = tk
    if best is not None:
        return best, 0
    tk = 512
    d_extra = pl.cdiv(d, tk) * tk - d
    return tk, d_extra


# ---------------------------------------------------------------------------
# Wrapper: fused Feature2MuStd heads + Reparametrizer in one pallas_call.
# ---------------------------------------------------------------------------
@jax.jit
def vae_head(features, w_pad, b_pad, eps):
    """features: (B, C, H, W) f32; w_pad/b_pad from prepare_head_params;
    eps: (B, L) f32 standard-normal noise.  Returns (mu, logvar, z), each (B, L).
    """
    batch = features.shape[0]
    d, n_pad = w_pad.shape
    hp = n_pad // 2
    latent = eps.shape[-1]

    x_flat = features.reshape(batch, -1)
    assert x_flat.shape[1] == d, "flattened feature width must match head weight"

    eps_pad = jnp.pad(eps, ((0, 0), (0, hp - latent))) if latent < hp else eps

    tb = batch if batch <= 256 else 256     # fills the 256-wide MXU on v6e/v7x
    nb = pl.cdiv(batch, tb)

    out_shape = (jax.ShapeDtypeStruct((batch, n_pad), features.dtype),
                 jax.ShapeDtypeStruct((batch, hp), features.dtype))

    # VMEM footprint of the resident-weight path (double-buffered BlockSpecs).
    fast_vmem = (2 * tb * d * 4            # x tile (f32)
                 + 2 * d * n_pad * 2       # fused bf16 weight buffers
                 + 2 * n_pad * 4           # bias
                 + 2 * tb * hp * 4         # eps
                 + 2 * tb * n_pad * 4      # mu|logvar out
                 + 2 * tb * hp * 4)        # z out

    if fast_vmem <= _VMEM_BUDGET:
        d_total = d
        kernel = _vae_head_resident_kernel
        dims = ("parallel",)
        grid_spec = pltpu.PrefetchScalarGridSpec(
            num_scalar_prefetch=0,
            grid=(nb,),
            in_specs=[
                pl.BlockSpec((tb, d), lambda b: (b, 0)),         # x tile
                pl.BlockSpec((d, n_pad), lambda b: (0, 0)),      # resident weight
                pl.BlockSpec((1, n_pad), lambda b: (0, 0)),      # fused bias
                pl.BlockSpec((tb, hp), lambda b: (b, 0)),        # eps tile
            ],
            out_specs=[
                pl.BlockSpec((tb, n_pad), lambda b: (b, 0)),     # [mu | logvar]
                pl.BlockSpec((tb, hp), lambda b: (b, 0)),        # z
            ],
        )
        operands = (x_flat, w_pad, b_pad, eps_pad)
    else:
        tk, d_extra = _pick_tk(d)
        if d_extra:
            # Zero padding contributes nothing to the dot (no garbage in acc).
            x_flat = jnp.pad(x_flat, ((0, 0), (0, d_extra)))
            w_pad = jnp.pad(w_pad, ((0, d_extra), (0, 0)))
        d_total = d + d_extra
        nk = d_total // tk
        kernel = _vae_head_ktiled_kernel
        dims = ("parallel", "arbitrary")
        grid_spec = pltpu.PrefetchScalarGridSpec(
            num_scalar_prefetch=0,
            grid=(nb, nk),
            in_specs=[
                pl.BlockSpec((tb, tk), lambda b, k: (b, k)),
                pl.BlockSpec((tk, n_pad), lambda b, k: (k, 0)),
                pl.BlockSpec((1, n_pad), lambda b, k: (0, 0)),
                pl.BlockSpec((tb, hp), lambda b, k: (b, 0)),
            ],
            out_specs=[
                pl.BlockSpec((tb, n_pad), lambda b, k: (b, 0)),
                pl.BlockSpec((tb, hp), lambda b, k: (b, 0)),
            ],
            scratch_shapes=[pltpu.VMEM((tb, n_pad), jnp.float32)],
        )
        operands = (x_flat, w_pad, b_pad, eps_pad)

    mulv, z_pad = pl.pallas_call(
        kernel,
        out_shape=out_shape,
        grid_spec=grid_spec,
        compiler_params=pltpu.CompilerParams(
            dimension_semantics=dims,
            vmem_limit_bytes=32 * 1024 * 1024,
        ),
        cost_estimate=pl.CostEstimate(
            flops=2 * batch * d_total * n_pad + 3 * batch * hp,
            transcendentals=batch * hp,
            bytes_accessed=(batch * d_total * 4 + d_total * n_pad * 2
                            + n_pad * 4 + batch * hp * 4
                            + batch * n_pad * 4 + batch * hp * 4),
        ),
    )(*operands)

    mu = mulv[:, :latent]
    logvar = mulv[:, hp:hp + latent]
    z = z_pad[:, :latent]
    return mu, logvar, z


# ---------------------------------------------------------------------------
# Parameter init mimicking torch.nn.Linear defaults.
# ---------------------------------------------------------------------------
def _init_linear_params(key, in_features, out_features, dtype=jnp.float32):
    """Uniform(+-1/sqrt(fan_in)); weight returned transposed as (D, L)."""
    k_w, k_b = jax.random.split(key)
    bound = float(in_features) ** -0.5
    w = jax.random.uniform(k_w, (in_features, out_features), dtype,
                           minval=-bound, maxval=bound)
    b = jax.random.uniform(k_b, (out_features,), dtype,
                           minval=-bound, maxval=bound)
    return w, b


if __name__ == "__main__":
    # Small shapes: batch=2, channels=4, spatial=16 -> D = 4*16*16 = 1024
    B, C, H, W = 2, 4, 16, 16
    enc_out_dim = C * H * W
    latent_dim = 32

    root = jax.random.PRNGKey(0)
    k_x, k_mu, k_lv, k_eps = jax.random.split(root, 4)

    features = jax.random.normal(k_x, (B, C, H, W), dtype=jnp.float32)
    w_mu, b_mu = _init_linear_params(k_mu, enc_out_dim, latent_dim)
    w_lv, b_lv = _init_linear_params(k_lv, enc_out_dim, latent_dim)
    eps = jax.random.normal(k_eps, (B, latent_dim), dtype=jnp.float32)

    # One-time setup: fuse + lane-pad head params, store weights as bf16.
    w_pad, b_pad = prepare_head_params(w_mu, b_mu, w_lv, b_lv)

    mu, logvar, z = vae_head(features, w_pad, b_pad, eps)
    jax.block_until_ready((mu, logvar, z))

    # --- Reference checks (matched bf16-weight precision) ------------------
    x_flat = features.reshape(B, -1)
    w_cat = jnp.concatenate([w_mu, w_lv], axis=1).astype(jnp.bfloat16)
    b_cat = jnp.concatenate([b_mu, b_lv]).reshape(1, 2 * latent_dim)
    head_ref = jnp.dot(x_flat.astype(jnp.bfloat16), w_cat,
                       preferred_element_type=jnp.float32) + b_cat
    mu_ref = head_ref[:, :latent_dim]
    lv_ref = head_ref[:, latent_dim:]
    z_ref = mu_ref + jnp.exp(0.5 * lv_ref) * eps

    assert mu.shape == (B, latent_dim) and logvar.shape == (B, latent_dim)
    assert z.shape == (B, latent_dim)
    assert jnp.allclose(mu, mu_ref, atol=1e-3, rtol=1e-3)
    assert jnp.allclose(logvar, lv_ref, atol=1e-3, rtol=1e-3)
    assert jnp.allclose(z, z_ref, atol=1e-3, rtol=1e-3)
    # Reparametrizer identity against the kernel's own mu/logvar (exact math).
    assert jnp.allclose(z, mu + jnp.exp(0.5 * logvar) * eps, atol=1e-5, rtol=1e-5)

    print("KERNEL_OK")
</pallas_src>

<mosaic_0001>
module attributes {stable_mosaic.version = 11 : i64} {
  func.func @_vae_head_resident_kernel(%arg0: i32, %arg1: memref<2x1024xf32, #tpu.memory_space<vmem>>, %arg2: memref<1024x256xbf16, #tpu.memory_space<vmem>>, %arg3: memref<1x256xf32, #tpu.memory_space<vmem>>, %arg4: memref<2x128xf32, #tpu.memory_space<vmem>>, %arg5: memref<2x256xf32, #tpu.memory_space<vmem>>, %arg6: memref<2x128xf32, #tpu.memory_space<vmem>>) attributes {dimension_semantics = [#tpu.dimension_semantics<parallel>], iteration_bounds = array<i64: 1>, scalar_prefetch = 0 : i64, scratch_operands = 0 : i64, tpu.core_type = #tpu.core_type<tc>, window_params = [{transform_indices = @transform_0, window_bounds = array<i64: 2, 1024>}, {pipeline_mode = #tpu.pipeline_mode<synchronous>, transform_indices = @transform_1, window_bounds = array<i64: 1024, 256>}, {pipeline_mode = #tpu.pipeline_mode<synchronous>, transform_indices = @transform_2, window_bounds = array<i64: 1, 256>}, {transform_indices = @transform_3, window_bounds = array<i64: 2, 128>}, {transform_indices = @transform_4, window_bounds = array<i64: 2, 256>}, {transform_indices = @transform_5, window_bounds = array<i64: 2, 128>}]} {
    %c0 = arith.constant 0 : index
    %c0_0 = arith.constant 0 : index
    %0 = vector.load %arg1[%c0, %c0_0] : memref<2x1024xf32, #tpu.memory_space<vmem>>, vector<2x1024xf32>
    %1 = arith.truncf %0 : vector<2x1024xf32> to vector<2x1024xbf16>
    %c0_1 = arith.constant 0 : index
    %c0_2 = arith.constant 0 : index
    %2 = vector.load %arg2[%c0_1, %c0_2] : memref<1024x256xbf16, #tpu.memory_space<vmem>>, vector<1024x256xbf16>
    %cst = arith.constant dense<0.000000e+00> : vector<2x256xf32>
    %3 = tpu.matmul %1, %2, %cst {dimension_numbers = #tpu.dot_dimension_numbers<[1], [0], [0], [1], [0, 0, 1, 1], [], []>} : vector<2x1024xbf16>, vector<1024x256xbf16>, vector<2x256xf32> -> vector<2x256xf32>
    %c0_3 = arith.constant 0 : index
    %c0_4 = arith.constant 0 : index
    %4 = vector.load %arg3[%c0_3, %c0_4] : memref<1x256xf32, #tpu.memory_space<vmem>>, vector<1x256xf32>
    %5 = vector.broadcast %4 : vector<1x256xf32> to vector<2x256xf32>
    %6 = arith.addf %3, %5 : vector<2x256xf32>
    %c0_5 = arith.constant 0 : index
    %c0_6 = arith.constant 0 : index
    %7 = vector.load %arg5[%c0_5, %c0_6] : memref<2x256xf32, #tpu.memory_space<vmem>>, vector<2x256xf32>
    tpu.vector_store %arg5[%c0_5, %c0_6], %6 {strides = array<i32>} : memref<2x256xf32, #tpu.memory_space<vmem>>, vector<2x256xf32>,
    %8 = vector.extract_strided_slice %6 {offsets = [0, 0], sizes = [2, 128], strides = [1, 1]} : vector<2x256xf32> to vector<2x128xf32>
    %9 = vector.extract_strided_slice %6 {offsets = [0, 128], sizes = [2, 128], strides = [1, 1]} : vector<2x256xf32> to vector<2x128xf32>
    %cst_7 = arith.constant 5.000000e-01 : f32
    %10 = vector.broadcast %cst_7 : f32 to vector<2x128xf32>
    %11 = arith.mulf %10, %9 : vector<2x128xf32>
    %12 = math.exp %11 : vector<2x128xf32>
    %c0_8 = arith.constant 0 : index
    %c0_9 = arith.constant 0 : index
    %13 = vector.load %arg4[%c0_8, %c0_9] : memref<2x128xf32, #tpu.memory_space<vmem>>, vector<2x128xf32>
    %14 = arith.mulf %12, %13 : vector<2x128xf32>
    %15 = arith.addf %8, %14 : vector<2x128xf32>
    %c0_10 = arith.constant 0 : index
    %c0_11 = arith.constant 0 : index
    %16 = vector.load %arg6[%c0_10, %c0_11] : memref<2x128xf32, #tpu.memory_space<vmem>>, vector<2x128xf32>
    tpu.vector_store %arg6[%c0_10, %c0_11], %15 {strides = array<i32>} : memref<2x128xf32, #tpu.memory_space<vmem>>, vector<2x128xf32>,
    return
  }
  func.func @transform_0(%arg0: i32) -> (i32, i32) {
    %c0_i32 = arith.constant 0 : i32
    %c0_i32_0 = arith.constant 0 : i32
    return %arg0, %c0_i32 : i32, i32
  }
  func.func @transform_1(%arg0: i32) -> (i32, i32) {
    %c0_i32 = arith.constant 0 : i32
    %c0_i32_0 = arith.constant 0 : i32
    %c0_i32_1 = arith.constant 0 : i32
    return %c0_i32, %c0_i32_0 : i32, i32
  }
  func.func @transform_2(%arg0: i32) -> (i32, i32) {
    %c0_i32 = arith.constant 0 : i32
    %c0_i32_0 = arith.constant 0 : i32
    %c0_i32_1 = arith.constant 0 : i32
    return %c0_i32, %c0_i32_0 : i32, i32
  }
  func.func @transform_3(%arg0: i32) -> (i32, i32) {
    %c0_i32 = arith.constant 0 : i32
    %c0_i32_0 = arith.constant 0 : i32
    return %arg0, %c0_i32 : i32, i32
  }
  func.func @transform_4(%arg0: i32) -> (i32, i32) {
    %c0_i32 = arith.constant 0 : i32
    %c0_i32_0 = arith.constant 0 : i32
    return %arg0, %c0_i32 : i32, i32
  }
  func.func @transform_5(%arg0: i32) -> (i32, i32) {
    %c0_i32 = arith.constant 0 : i32
    %c0_i32_0 = arith.constant 0 : i32
    return %arg0, %c0_i32 : i32, i32
  }
}

</mosaic_0001>

<bundles_post_ra>
// kernel: vae_head.1
= control target key start
LH: loop header
LB: loop body
LE: loop exit
PB: predicated region body
PF: predicated region fallthrough
CT: control target
= control target key end

     0   :  { %11 = vsyncpa [#allocation3], 0  ;;  %s1557_s0 = inlined_call_operand.vmem [shape: f32[2,1024], index: 0, kind: input, shape index: {}]   ;;  %s1558_s1 = inlined_call_operand.hbm [shape: bf16[1024,256], index: 1, kind: input, shape index: {}]   ;;  %s1559_s2 = inlined_call_operand.vmem [shape: f32[1,256], index: 2, kind: input, shape index: {}]   ;;  %s1560_s3 = inlined_call_operand.vmem [shape: f32[2,128], index: 3, kind: input, shape index: {}]   ;;  %s1561_s4 = inlined_call_operand.vmem [shape: f32[2,256], index: 4, kind: output, shape index: {0}]   ;;  %s1562_s5 = inlined_call_operand.hbm [shape: f32[2,128], index: 5, kind: output, shape index: {1}]  }
   0x1   :  { %12 = vsyncpa [#allocation4], 0  ;;  %s1460_s18 = smov [#allocation2]   ;;  %s1412_s22 = scalar_lea.hbm %s1558_s1, 16384 }
   0x2   :  { %s20_s19 = sshll.u32 %s1460_s18, 4  ;;  %p1413_p0 = scmp.ne.s32.totalorder %s1558_s1, %s1412_s22  ;;  %s21_s19 = int_to_ptr.vmem [resolvable:$true] %s20_s19 }
   0x3   :  { %p1416_p1 = scmp.lt.u32.totalorder %s1412_s22, %s1558_s1 }
   0x5   :  { %p1418_p2 = pnand %p1416_p1, %p1413_p0 }
   0x7   :  { %1421 = shalt.err (!%p1418_p2)
}
   0x8   :  { %s1422_s27 = scalar_lea.vmem %s21_s19, 16384  ;;  %p1427_p4 = scmp.lt.s32.totalorder %s21_s19, %s21_s19 }
   0x9   :  { %p1423_p3 = scmp.ne.s32.totalorder %s21_s19, %s1422_s27  ;;  %p1428_p5 = scmp.lt.s32.totalorder %s1422_s27, %s1422_s27 }
   0xb   :  { %p1429_p6 = por %p1428_p5, %p1427_p4 }
   0xd   :  { %p1430_p7 = pnand %p1429_p6, %p1423_p3 }
   0xf   :  { %1433 = shalt.err (!%p1430_p7)
}
  0x10   :  { %s1461_s28 = smov 128   ;;  %s1462_s29 = smov 8  }
  0x11   :  { %26 = dma.hbm_to_vmem [thread:$0]  %s1558_s1, 16384, %s21_s19, [#allocation3], %s1461_s28, %s1461_s28, %s1462_s29  }
  0x12   :  { %1456 = dma.done.wait [#allocation3], 16384  }
  0x13   :  { %1457 = vsyncadd [#allocation3], 4294950912  ;;  %v1216_v0 = vld [vmem:[#allocation2 + $0x4] ss:$8 sps:$4 sm:$0xff]   ;;  %v1220_v2 = vld [vmem:[#allocation2] ss:$8 sps:$4 sm:$0xff]   ;;  %v42_v38 = vlaneseq }
  0x14   :  { %v1218_v1 = vld [vmem:[#allocation2 + $0x204] ss:$8 sps:$4 sm:$0xff]   ;;  %868 = vmatprep.subr.bf16.mxu1 %v1216_v0  ;;  %v1221_v3 = vld [vmem:[#allocation2 + $0x200] ss:$8 sps:$4 sm:$0xff]   ;;  %v1222_v4 = vld [vmem:[#allocation2 + $0x14] ss:$8 sps:$4 sm:$0xff]  }
  0x15   :  { %950 = vmatprep.subr.bf16.mxu0 %v1218_v1  ;;  %869 = vmatpush1.bf16.msra.mxu1 %v1220_v2  ;;  %v1224_v5 = vld [vmem:[#allocation2 + $0x214] ss:$8 sps:$4 sm:$0xff]   ;;  %v1226_v6 = vld [vmem:[#allocation2 + $0x10] ss:$8 sps:$4 sm:$0xff]   ;;  %v1228_v8 = vld [vmem:[#allocation2 + $0x24] ss:$8 sps:$4 sm:$0xff]  }
  0x16   :  { %951 = vmatpush1.bf16.msra.mxu0 %v1221_v3  ;;  %870 = vmatprep.subr.bf16.mxu1 %v1222_v4  ;;  %v1227_v7 = vld [vmem:[#allocation2 + $0x210] ss:$8 sps:$4 sm:$0xff]   ;;  %v1230_v9 = vld [vmem:[#allocation2 + $0x224] ss:$8 sps:$4 sm:$0xff]   ;;  %v1232_v10 = vld [vmem:[#allocation2 + $0x20] ss:$8 sps:$4 sm:$0xff]  }
  0x17   :  { %952 = vmatprep.subr.bf16.mxu0 %v1224_v5  ;;  %v1233_v11 = vld [vmem:[#allocation2 + $0x220] ss:$8 sps:$4 sm:$0xff]   ;;  %v1234_v12 = vld [vmem:[#allocation2 + $0x34] ss:$8 sps:$4 sm:$0xff]   ;;  %v1238_v14 = vld [vmem:[#allocation2 + $0x30] ss:$8 sps:$4 sm:$0xff]  }
  0x18   :  { %v1236_v13 = vld [vmem:[#allocation2 + $0x234] ss:$8 sps:$4 sm:$0xff]   ;;  %v1239_v15 = vld [vmem:[#allocation2 + $0x230] ss:$8 sps:$4 sm:$0xff]   ;;  %v1240_v16 = vld [vmem:[#allocation2 + $0x44] ss:$8 sps:$4 sm:$0xff]  }
  0x19   :  { %871 = vmatpush1.bf16.msra.mxu1 %v1226_v6  ;;  %v1242_v17 = vld [vmem:[#allocation2 + $0x244] ss:$8 sps:$4 sm:$0xff]   ;;  %v1244_v18 = vld [vmem:[#allocation2 + $0x40] ss:$8 sps:$4 sm:$0xff]   ;;  %v1246_v20 = vld [vmem:[#allocation2 + $0x54] ss:$8 sps:$4 sm:$0xff]  }
  0x1a   :  { %953 = vmatpush1.bf16.msra.mxu0 %v1227_v7  ;;  %872 = vmatprep.subr.bf16.mxu1 %v1228_v8  ;;  %v1245_v19 = vld [vmem:[#allocation2 + $0x240] ss:$8 sps:$4 sm:$0xff]   ;;  %v1248_v21 = vld [vmem:[#allocation2 + $0x254] ss:$8 sps:$4 sm:$0xff]   ;;  %v1250_v22 = vld [vmem:[#allocation2 + $0x50] ss:$8 sps:$4 sm:$0xff]  }
  0x1b   :  { %954 = vmatprep.subr.bf16.mxu0 %v1230_v9  ;;  %v1251_v23 = vld [vmem:[#allocation2 + $0x250] ss:$8 sps:$4 sm:$0xff]   ;;  %v1252_v24 = vld [vmem:[#allocation2 + $0x64] ss:$8 sps:$4 sm:$0xff]   ;;  %v1256_v26 = vld [vmem:[#allocation2 + $0x60] ss:$8 sps:$4 sm:$0xff]  }
  0x1c   :  { %v1254_v25 = vld [vmem:[#allocation2 + $0x264] ss:$8 sps:$4 sm:$0xff]   ;;  %v1257_v27 = vld [vmem:[#allocation2 + $0x260] ss:$8 sps:$4 sm:$0xff]   ;;  %v1258_v28 = vld [vmem:[#allocation2 + $0x74] ss:$8 sps:$4 sm:$0xff]  }
  0x1d   :  { %873 = vmatpush1.bf16.msra.mxu1 %v1232_v10  ;;  %v1260_v29 = vld [vmem:[#allocation2 + $0x274] ss:$8 sps:$4 sm:$0xff]   ;;  %v1262_v30 = vld [vmem:[#allocation2 + $0x70] ss:$8 sps:$4 sm:$0xff]   ;;  %v1264_v32 = vld [vmem:[#allocation2 + $0x84] ss:$8 sps:$4 sm:$0xff]  }
  0x1e   :  { %955 = vmatpush1.bf16.msra.mxu0 %v1233_v11  ;;  %874 = vmatprep.subr.bf16.mxu1 %v1234_v12  ;;  %v1263_v31 = vld [vmem:[#allocation2 + $0x270] ss:$8 sps:$4 sm:$0xff]   ;;  %v1266_v33 = vld [vmem:[#allocation2 + $0x284] ss:$8 sps:$4 sm:$0xff]   ;;  %v1268_v34 = vld [vmem:[#allocation2 + $0x80] ss:$8 sps:$4 sm:$0xff]  }
  0x1f   :  { %956 = vmatprep.subr.bf16.mxu0 %v1236_v13  ;;  %v1269_v35 = vld [vmem:[#allocation2 + $0x280] ss:$8 sps:$4 sm:$0xff]   ;;  %v1463_v36 = vmov 1983009808   ;;  %v1270_v39 = vld [vmem:[#allocation2 + $0x94] ss:$8 sps:$4 sm:$0xff]  }
  0x20   :  { %v40_v37 = vunpack.c.l.s4 %v1463_v36  ;;  %v1272_v40 = vld [vmem:[#allocation2 + $0x294] ss:$8 sps:$4 sm:$0xff]   ;;  %v1274_v41 = vld [vmem:[#allocation2 + $0x90] ss:$8 sps:$4 sm:$0xff]   ;;  %v1507_v43 = vshrl.u32 %v42_v38, 7  ;;  %v34_v52 = vld [vmem:[%s1557_s0] sm:$0xff] }
  0x21   :  { %875 = vmatpush1.bf16.msra.mxu1 %v1238_v14  ;;  %v1275_v44 = vld [vmem:[#allocation2 + $0x290] ss:$8 sps:$4 sm:$0xff]   ;;  %v1276_v45 = vld [vmem:[#allocation2 + $0xa4] ss:$8 sps:$4 sm:$0xff]   ;;  %v1280_v47 = vld [vmem:[#allocation2 + $0xa0] ss:$8 sps:$4 sm:$0xff]   ;;  %v38_v8 = vcombine.high %v34_v52, %v34_v52 }
  0x22   :  { %957 = vmatpush1.bf16.msra.mxu0 %v1239_v15  ;;  %876 = vmatprep.subr.bf16.mxu1 %v1240_v16  ;;  %v41_v42 = vunpack.c.0.s8 %v40_v37  ;;  %v1278_v46 = vld [vmem:[#allocation2 + $0x2a4] ss:$8 sps:$4 sm:$0xff]   ;;  %v1281_v48 = vld [vmem:[#allocation2 + $0x2a0] ss:$8 sps:$4 sm:$0xff]   ;;  %v1282_v50 = vld [vmem:[#allocation2 + $0xb4] ss:$8 sps:$4 sm:$0xff]  }
  0x23   :  { %958 = vmatprep.subr.bf16.mxu0 %v1242_v17  ;;  %v1284_v51 = vld [vmem:[#allocation2 + $0x2b4] ss:$8 sps:$4 sm:$0xff]   ;;  %v1286_v53 = vld [vmem:[#allocation2 + $0xb0] ss:$8 sps:$4 sm:$0xff]   ;;  %v35_v56 = vld [vmem:[%s1557_s0 + $0x8] sm:$0xff]  ;;  %s1464_s14 = smov [#allocation5]  }
  0x24   :  { %v44_v49 = vsub.s32 %v41_v42, %v1507_v43  ;;  %v1287_v55 = vld [vmem:[#allocation2 + $0x2b0] ss:$8 sps:$4 sm:$0xff]   ;;  %v1288_v57 = vld [vmem:[#allocation2 + $0xc4] ss:$8 sps:$4 sm:$0xff]   ;;  %v1292_v63 = vld [vmem:[#allocation2 + $0xc0] ss:$8 sps:$4 sm:$0xff]   ;;  %v55_v9 = vcombine.high %v35_v56, %v35_v56 }
  0x25   :  { %877 = vmatpush1.bf16.msra.mxu1 %v1244_v18  ;;  %v1290_v58 = vld [vmem:[#allocation2 + $0x2c4] ss:$8 sps:$4 sm:$0xff]   ;;  %v1293_v0 = vld [vmem:[#allocation2 + $0x2c0] ss:$8 sps:$4 sm:$0xff]   ;;  %v1294_v1 = vld [vmem:[#allocation2 + $0xd4] ss:$8 sps:$4 sm:$0xff]  }
  0x26   :  { %959 = vmatpush1.bf16.msra.mxu0 %v1245_v19  ;;  %878 = vmatprep.subr.bf16.mxu1 %v1246_v20  ;;  %v1513_v54 = vrot.slane %v34_v52, %v44_v49  ;;  %v62_v60 = vrot.slane %v35_v56, %v44_v49  ;;  %v1296_v2 = vld [vmem:[#allocation2 + $0x2d4] ss:$8 sps:$4 sm:$0xff]   ;;  %v1298_v4 = vld [vmem:[#allocation2 + $0xd0] ss:$8 sps:$4 sm:$0xff]   ;;  %v1300_v6 = vld [vmem:[#allocation2 + $0xe4] ss:$8 sps:$4 sm:$0xff]   ;;  %v1520_v14 = vrot.slane %v38_v8, %v44_v49 }
  0x27   :  { %960 = vmatprep.subr.bf16.mxu0 %v1248_v21  ;;  %v1299_v5 = vld [vmem:[#allocation2 + $0x2d0] ss:$8 sps:$4 sm:$0xff]   ;;  %v1302_v7 = vld [vmem:[#allocation2 + $0x2e4] ss:$8 sps:$4 sm:$0xff]   ;;  %v1304_v10 = vld [vmem:[#allocation2 + $0xe0] ss:$8 sps:$4 sm:$0xff]   ;;  %v1522_v15 = vrot.slane %v55_v9, %v44_v49 }
  0x28   :  { %v53_v59 = vcombine.high %v1513_v54, %v1513_v54  ;;  %v70_v62 = vcombine.high %v62_v60, %v62_v60  ;;  %v1305_v11 = vld [vmem:[#allocation2 + $0x2e0] ss:$8 sps:$4 sm:$0xff]   ;;  %v1306_v12 = vld [vmem:[#allocation2 + $0xf4] ss:$8 sps:$4 sm:$0xff]   ;;  %v1310_v16 = vld [vmem:[#allocation2 + $0xf0] ss:$8 sps:$4 sm:$0xff]   ;;  %v54_v20 = vcombine.high %v1520_v14, %v1520_v14 }
  0x29   :  { %879 = vmatpush1.bf16.msra.mxu1 %v1250_v22  ;;  %v1308_v13 = vld [vmem:[#allocation2 + $0x2f4] ss:$8 sps:$4 sm:$0xff]   ;;  %v1311_v17 = vld [vmem:[#allocation2 + $0x2f0] ss:$8 sps:$4 sm:$0xff]   ;;  %v1315_v18 = vld [vmem:[#allocation2 + $0x104] ss:$8 sps:$4 sm:$0xff]   ;;  %v71_v21 = vcombine.high %v1522_v15, %v1522_v15  ;;  %v80_v22 = vpack.c.bf16 %v1513_v54, %v1513_v54 }
  0x2a   :  { %961 = vmatpush1.bf16.msra.mxu0 %v1251_v23  ;;  %880 = vmatprep.subr.bf16.mxu1 %v1252_v24  ;;  %v81_v61 = vpack.c.bf16 %v53_v59, %v53_v59  ;;  %v85_v3 = vpack.c.bf16 %v70_v62, %v70_v62  ;;  %v1319_v19 = vld [vmem:[#allocation2 + $0x304] ss:$8 sps:$4 sm:$0xff]   ;;  %v84_v23 = vpack.c.bf16 %v62_v60, %v62_v60  ;;  %v1313_v24 = vld [vmem:[#allocation2 + $0x100] ss:$8 sps:$4 sm:$0xff]   ;;  %v1334_v36 = vld [vmem:[#allocation2 + $0x134] ss:$8 sps:$4 sm:$0xff]  }
  0x2b   :  { %962 = vmatprep.subr.bf16.mxu0 %v1254_v25  ;;  %v1317_v25 = vld [vmem:[#allocation2 + $0x300] ss:$8 sps:$4 sm:$0xff]   ;;  %v1337_v37 = vld [vmem:[#allocation2 + $0x334] ss:$8 sps:$4 sm:$0xff]   ;;  %v1332_v38 = vld [vmem:[#allocation2 + $0x130] ss:$8 sps:$4 sm:$0xff]  }
  0x2c   :  { %900 = vmatprep.mubr.bf16.mxu1 %v81_v61  ;;  %982 = vmatprep.mubr.bf16.mxu0 %v85_v3  ;;  %v1338_v42 = vld [vmem:[#allocation2 + $0x140] ss:$8 sps:$4 sm:$0xff]   ;;  %v1352_v49 = vld [vmem:[#allocation2 + $0x164] ss:$8 sps:$4 sm:$0xff]   ;;  %v1361_v54 = vld [vmem:[#allocation2 + $0x374] ss:$8 sps:$4 sm:$0xff]  }
  0x2d   :  { %881 = vmatpush1.bf16.msra.mxu1 %v1256_v26  ;;  %v1322_v26 = vld [vmem:[#allocation2 + $0x114] ss:$8 sps:$4 sm:$0xff]   ;;  %v1353_v52 = vld [vmem:[#allocation2 + $0x360] ss:$8 sps:$4 sm:$0xff]   ;;  %v1359_v56 = vld [vmem:[#allocation2 + $0x370] ss:$8 sps:$4 sm:$0xff]  }
  0x2e   :  { %963 = vmatpush1.bf16.msra.mxu0 %v1257_v27  ;;  %882 = vmatprep.subr.bf16.mxu1 %v1258_v28  ;;  %v1325_v27 = vld [vmem:[#allocation2 + $0x314] ss:$8 sps:$4 sm:$0xff]   ;;  %v83_v28 = vpack.c.bf16 %v54_v20, %v54_v20  ;;  %v1362_v59 = vld [vmem:[#allocation2 + $0x180] ss:$8 sps:$4 sm:$0xff]   ;;  %v1383_v8 = vld [vmem:[#allocation2 + $0x3b0] ss:$8 sps:$4 sm:$0xff]  }
  0x2f   :  { %964 = vmatprep.subr.bf16.mxu0 %v1260_v29  ;;  %v87_v29 = vpack.c.bf16 %v71_v21, %v71_v21  ;;  %v1365_v60 = vld [vmem:[#allocation2 + $0x380] ss:$8 sps:$4 sm:$0xff]   ;;  %v1370_v61 = vld [vmem:[#allocation2 + $0x194] ss:$8 sps:$4 sm:$0xff]   ;;  %v1388_v9 = vld [vmem:[#allocation2 + $0x1c4] ss:$8 sps:$4 sm:$0xff]  }
  0x30   :  { %v1373_v62 = vld [vmem:[#allocation2 + $0x394] ss:$8 sps:$4 sm:$0xff]   ;;  %v1374_v3 = vld [vmem:[#allocation2 + $0x1a0] ss:$8 sps:$4 sm:$0xff]   ;;  %v1403_v20 = vld [vmem:[#allocation2 + $0x3e4] ss:$8 sps:$4 sm:$0xff]  }
  0x31   :  { %883 = vmatpush1.bf16.msra.mxu1 %v1262_v30  ;;  %v1320_v30 = vld [vmem:[#allocation2 + $0x110] ss:$8 sps:$4 sm:$0xff]   ;;  %v1398_v21 = vld [vmem:[#allocation2 + $0x1e0] ss:$8 sps:$4 sm:$0xff]   ;;  %s1059_s15 = sshll.u32 %s1464_s14, 4  ;;  %s1060_s15 = int_to_ptr.vmem [resolvable:$true] %s1059_s15 }
  0x32   :  { %965 = vmatpush1.bf16.msra.mxu0 %v1263_v31  ;;  %884 = vmatprep.subr.bf16.mxu1 %v1264_v32  ;;  %v1323_v31 = vld [vmem:[#allocation2 + $0x310] ss:$8 sps:$4 sm:$0xff]   ;;  %v1328_v32 = vld [vmem:[#allocation2 + $0x124] ss:$8 sps:$4 sm:$0xff]   ;;  %s1434_s16 = scalar_lea.vmem %s1060_s15, 32  ;;  %p1439_p9 = scmp.lt.s32.totalorder %s1060_s15, %s1060_s15 }
  0x33   :  { %966 = vmatprep.subr.bf16.mxu0 %v1266_v33  ;;  %v1331_v33 = vld [vmem:[#allocation2 + $0x324] ss:$8 sps:$4 sm:$0xff]   ;;  %p1435_p8 = scmp.ne.s32.totalorder %s1060_s15, %s1434_s16  ;;  %p1440_p10 = scmp.lt.s32.totalorder %s1434_s16, %s1434_s16 }
  0x35   :  { %885 = vmatpush1.bf16.msra.mxu1 %v1268_v34  ;;  %v1326_v34 = vld [vmem:[#allocation2 + $0x120] ss:$8 sps:$4 sm:$0xff]   ;;  %p1441_p11 = por %p1440_p10, %p1439_p9 }
  0x36   :  { %967 = vmatpush1.bf16.msra.mxu0 %v1269_v35  ;;  %886 = vmatprep.subr.bf16.mxu1 %v1270_v39  ;;  %v1329_v35 = vld [vmem:[#allocation2 + $0x320] ss:$8 sps:$4 sm:$0xff]   ;;  %v1335_v39 = vld [vmem:[#allocation2 + $0x330] ss:$8 sps:$4 sm:$0xff]  }
  0x37   :  { %968 = vmatprep.subr.bf16.mxu0 %v1272_v40  ;;  %v1340_v40 = vld [vmem:[#allocation2 + $0x144] ss:$8 sps:$4 sm:$0xff]   ;;  %p1442_p12 = pnand %p1441_p11, %p1435_p8 }
  0x39   :  { %887 = vmatpush1.bf16.msra.mxu1 %v1274_v41  ;;  %v1343_v41 = vld [vmem:[#allocation2 + $0x344] ss:$8 sps:$4 sm:$0xff]  }
  0x3a   :  { %969 = vmatpush1.bf16.msra.mxu0 %v1275_v44  ;;  %888 = vmatprep.subr.bf16.mxu1 %v1276_v45  ;;  %v1341_v44 = vld [vmem:[#allocation2 + $0x340] ss:$8 sps:$4 sm:$0xff]   ;;  %v1346_v45 = vld [vmem:[#allocation2 + $0x154] ss:$8 sps:$4 sm:$0xff]  }
  0x3b   :  { %970 = vmatprep.subr.bf16.mxu0 %v1278_v46  ;;  %v1349_v46 = vld [vmem:[#allocation2 + $0x354] ss:$8 sps:$4 sm:$0xff]  }
  0x3d   :  { %889 = vmatpush1.bf16.msra.mxu1 %v1280_v47  ;;  %v1344_v47 = vld [vmem:[#allocation2 + $0x150] ss:$8 sps:$4 sm:$0xff]  }
  0x3e   :  { %971 = vmatpush1.bf16.msra.mxu0 %v1281_v48  ;;  %890 = vmatprep.subr.bf16.mxu1 %v1282_v50  ;;  %v1347_v48 = vld [vmem:[#allocation2 + $0x350] ss:$8 sps:$4 sm:$0xff]   ;;  %v1355_v50 = vld [vmem:[#allocation2 + $0x364] ss:$8 sps:$4 sm:$0xff]  }
  0x3f   :  { %972 = vmatprep.subr.bf16.mxu0 %v1284_v51  ;;  %v1350_v51 = vld [vmem:[#allocation2 + $0x160] ss:$8 sps:$4 sm:$0xff]  }
  0x41   :  { %891 = vmatpush1.bf16.msra.mxu1 %v1286_v53  ;;  %v1358_v53 = vld [vmem:[#allocation2 + $0x174] ss:$8 sps:$4 sm:$0xff]  }
  0x42   :  { %973 = vmatpush1.bf16.msra.mxu0 %v1287_v55  ;;  %892 = vmatprep.subr.bf16.mxu1 %v1288_v57  ;;  %v1356_v55 = vld [vmem:[#allocation2 + $0x170] ss:$8 sps:$4 sm:$0xff]   ;;  %v1364_v57 = vld [vmem:[#allocation2 + $0x184] ss:$8 sps:$4 sm:$0xff]  }
  0x43   :  { %974 = vmatprep.subr.bf16.mxu0 %v1290_v58  ;;  %v1367_v58 = vld [vmem:[#allocation2 + $0x384] ss:$8 sps:$4 sm:$0xff]  }
  0x45   :  { %893 = vmatpush1.bf16.msra.mxu1 %v1292_v63  ;;  %v1368_v63 = vld [vmem:[#allocation2 + $0x190] ss:$8 sps:$4 sm:$0xff]  }
  0x46   :  { %975 = vmatpush1.bf16.msra.mxu0 %v1293_v0  ;;  %894 = vmatprep.subr.bf16.mxu1 %v1294_v1  ;;  %v1371_v0 = vld [vmem:[#allocation2 + $0x390] ss:$8 sps:$4 sm:$0xff]   ;;  %v1376_v1 = vld [vmem:[#allocation2 + $0x1a4] ss:$8 sps:$4 sm:$0xff]  }
  0x47   :  { %976 = vmatprep.subr.bf16.mxu0 %v1296_v2  ;;  %v1379_v2 = vld [vmem:[#allocation2 + $0x3a4] ss:$8 sps:$4 sm:$0xff]  }
  0x49   :  { %895 = vmatpush1.bf16.msra.mxu1 %v1298_v4  ;;  %v1377_v4 = vld [vmem:[#allocation2 + $0x3a0] ss:$8 sps:$4 sm:$0xff]  }
  0x4a   :  { %977 = vmatpush1.bf16.msra.mxu0 %v1299_v5  ;;  %896 = vmatprep.subr.bf16.mxu1 %v1300_v6  ;;  %v1382_v5 = vld [vmem:[#allocation2 + $0x1b4] ss:$8 sps:$4 sm:$0xff]  }
  0x4b   :  { %978 = vmatprep.subr.bf16.mxu0 %v1302_v7  ;;  %v1385_v6 = vld [vmem:[#allocation2 + $0x3b4] ss:$8 sps:$4 sm:$0xff]   ;;  %v1380_v7 = vld [vmem:[#allocation2 + $0x1b0] ss:$8 sps:$4 sm:$0xff]  }
  0x4d   :  { %897 = vmatpush1.bf16.msra.mxu1 %v1304_v10  ;;  %v1391_v10 = vld [vmem:[#allocation2 + $0x3c4] ss:$8 sps:$4 sm:$0xff]  }
  0x4e   :  { %979 = vmatpush1.bf16.msra.mxu0 %v1305_v11  ;;  %898 = vmatprep.subr.bf16.mxu1 %v1306_v12  ;;  %v1386_v11 = vld [vmem:[#allocation2 + $0x1c0] ss:$8 sps:$4 sm:$0xff]  }
  0x4f   :  { %980 = vmatprep.subr.bf16.mxu0 %v1308_v13  ;;  %v1389_v12 = vld [vmem:[#allocation2 + $0x3c0] ss:$8 sps:$4 sm:$0xff]   ;;  %v1394_v13 = vld [vmem:[#allocation2 + $0x1d4] ss:$8 sps:$4 sm:$0xff]  }
  0x51   :  { %899 = vmatpush1.bf16.msra.mxu1 %v1310_v16  ;;  %v1397_v16 = vld [vmem:[#allocation2 + $0x3d4] ss:$8 sps:$4 sm:$0xff]  }
  0x52   :  { %981 = vmatpush1.bf16.msra.mxu0 %v1311_v17  ;;  %909 = vmatprep.subr.bf16.mxu1 %v1315_v18  ;;  %v1392_v17 = vld [vmem:[#allocation2 + $0x1d0] ss:$8 sps:$4 sm:$0xff]  }
  0x53   :  { %991 = vmatprep.subr.bf16.mxu0 %v1319_v19  ;;  %v1395_v18 = vld [vmem:[#allocation2 + $0x3d0] ss:$8 sps:$4 sm:$0xff]   ;;  %v1400_v19 = vld [vmem:[#allocation2 + $0x1e4] ss:$8 sps:$4 sm:$0xff]  }
  0x54   :  { %901 = vmatmul.mubr.bf16.vlgmr.msra.gmra.mrb[0].mxu1 %v80_v22  ;;  %v1401_v22 = vld [vmem:[#allocation2 + $0x3e0] ss:$8 sps:$4 sm:$0xff]  }
  0x55   :  { %983 = vmatmul.mubr.bf16.vlgmr.msra.gmra.mrb[0].mxu0 %v84_v23  ;;  %910 = vmatpush1.bf16.msra.mxu1 %v1313_v24  ;;  %v1406_v23 = vld [vmem:[#allocation2 + $0x1f4] ss:$8 sps:$4 sm:$0xff]  }
  0x56   :  { %992 = vmatpush1.bf16.msra.mxu0 %v1317_v25  ;;  %911 = vmatprep.subr.bf16.mxu1 %v1322_v26  ;;  %v1409_v24 = vld [vmem:[#allocation2 + $0x3f4] ss:$8 sps:$4 sm:$0xff]   ;;  %v1404_v25 = vld [vmem:[#allocation2 + $0x1f0] ss:$8 sps:$4 sm:$0xff]  }
  0x57   :  { %993 = vmatprep.subr.bf16.mxu0 %v1325_v27  ;;  %941 = vmatprep.mubr.bf16.mxu1 %v83_v28  ;;  %v1407_v26 = vld [vmem:[#allocation2 + $0x3f0] ss:$8 sps:$4 sm:$0xff]   ;;  %v82_v27 = vpack.c.bf16 %v1520_v14, %v1520_v14  ;;  %v86_v28 = vpack.c.bf16 %v1522_v15, %v1522_v15 }
  0x58   :  { %1023 = vmatprep.mubr.bf16.mxu0 %v87_v29  ;;  %v220_v29 = vsub.s32 0, %v1507_v43 }
  0x59   :  { %912 = vmatpush1.bf16.msra.mxu1 %v1320_v30  ;;  %v216_v30 = vld [vmem:[%s1559_s2] sm:$0x3] }
  0x5a   :  { %994 = vmatpush1.bf16.msra.mxu0 %v1323_v31  ;;  %913 = vmatprep.subr.bf16.mxu1 %v1328_v32  ;;  %v224_v31 = vsub.s32 1, %v1507_v43  ;;  %v221_v32 = vrot.slane %v216_v30, %v220_v29 }
  0x5b   :  { %995 = vmatprep.subr.bf16.mxu0 %v1331_v33 }
  0x5c   :  { %v225_v33 = vrot.slane %v216_v30, %v224_v31 }
  0x5d   :  { %914 = vmatpush1.bf16.msra.mxu1 %v1326_v34 }
  0x5e   :  { %996 = vmatpush1.bf16.msra.mxu0 %v1329_v35  ;;  %915 = vmatprep.subr.bf16.mxu1 %v1334_v36 }
  0x5f   :  { %997 = vmatprep.subr.bf16.mxu0 %v1337_v37 }
  0x61   :  { %916 = vmatpush1.bf16.msra.mxu1 %v1332_v38 }
  0x62   :  { %998 = vmatpush1.bf16.msra.mxu0 %v1335_v39  ;;  %917 = vmatprep.subr.bf16.mxu1 %v1340_v40 }
  0x63   :  { %999 = vmatprep.subr.bf16.mxu0 %v1343_v41 }
  0x65   :  { %918 = vmatpush1.bf16.msra.mxu1 %v1338_v42 }
  0x66   :  { %1000 = vmatpush1.bf16.msra.mxu0 %v1341_v44  ;;  %919 = vmatprep.subr.bf16.mxu1 %v1346_v45 }
  0x67   :  { %1001 = vmatprep.subr.bf16.mxu0 %v1349_v46 }
  0x69   :  { %920 = vmatpush1.bf16.msra.mxu1 %v1344_v47  ;;  %v1047_v47 = vld [vmem:[%s1560_s3] sm:$0x3] }
  0x6a   :  { %1002 = vmatpush1.bf16.msra.mxu0 %v1347_v48  ;;  %921 = vmatprep.subr.bf16.mxu1 %v1352_v49 }
  0x6b   :  { %1003 = vmatprep.subr.bf16.mxu0 %v1355_v50 }
  0x6d   :  { %922 = vmatpush1.bf16.msra.mxu1 %v1350_v51 }
  0x6e   :  { %1004 = vmatpush1.bf16.msra.mxu0 %v1353_v52  ;;  %923 = vmatprep.subr.bf16.mxu1 %v1358_v53 }
  0x6f   :  { %1005 = vmatprep.subr.bf16.mxu0 %v1361_v54 }
  0x71   :  { %924 = vmatpush1.bf16.msra.mxu1 %v1356_v55 }
  0x72   :  { %1006 = vmatpush1.bf16.msra.mxu0 %v1359_v56  ;;  %925 = vmatprep.subr.bf16.mxu1 %v1364_v57 }
  0x73   :  { %1007 = vmatprep.subr.bf16.mxu0 %v1367_v58 }
  0x75   :  { %926 = vmatpush1.bf16.msra.mxu1 %v1362_v59 }
  0x76   :  { %1008 = vmatpush1.bf16.msra.mxu0 %v1365_v60  ;;  %927 = vmatprep.subr.bf16.mxu1 %v1370_v61 }
  0x77   :  { %1009 = vmatprep.subr.bf16.mxu0 %v1373_v62 }
  0x79   :  { %928 = vmatpush1.bf16.msra.mxu1 %v1368_v63 }
  0x7a   :  { %1010 = vmatpush1.bf16.msra.mxu0 %v1371_v0  ;;  %929 = vmatprep.subr.bf16.mxu1 %v1376_v1 }
  0x7b   :  { %1011 = vmatprep.subr.bf16.mxu0 %v1379_v2 }
  0x7d   :  { %930 = vmatpush1.bf16.msra.mxu1 %v1374_v3 }
  0x7e   :  { %1012 = vmatpush1.bf16.msra.mxu0 %v1377_v4  ;;  %931 = vmatprep.subr.bf16.mxu1 %v1382_v5 }
  0x7f   :  { %1013 = vmatprep.subr.bf16.mxu0 %v1385_v6 }
  0x81   :  { %932 = vmatpush1.bf16.msra.mxu1 %v1380_v7 }
  0x82   :  { %1014 = vmatpush1.bf16.msra.mxu0 %v1383_v8  ;;  %933 = vmatprep.subr.bf16.mxu1 %v1388_v9 }
  0x83   :  { %1015 = vmatprep.subr.bf16.mxu0 %v1391_v10 }
  0x85   :  { %934 = vmatpush1.bf16.msra.mxu1 %v1386_v11 }
  0x86   :  { %1016 = vmatpush1.bf16.msra.mxu0 %v1389_v12  ;;  %935 = vmatprep.subr.bf16.mxu1 %v1394_v13 }
  0x87   :  { %1017 = vmatprep.subr.bf16.mxu0 %v1397_v16 }
  0x89   :  { %936 = vmatpush1.bf16.msra.mxu1 %v1392_v17 }
  0x8a   :  { %1018 = vmatpush1.bf16.msra.mxu0 %v1395_v18  ;;  %937 = vmatprep.subr.bf16.mxu1 %v1400_v19 }
  0x8b   :  { %1019 = vmatprep.subr.bf16.mxu0 %v1403_v20 }
  0x8d   :  { %938 = vmatpush1.bf16.msra.mxu1 %v1398_v21 }
  0x8e   :  { %1020 = vmatpush1.bf16.msra.mxu0 %v1401_v22  ;;  %939 = vmatprep.subr.bf16.mxu1 %v1406_v23 }
  0x8f   :  { %1021 = vmatprep.subr.bf16.mxu0 %v1409_v24 }
  0x91   :  { %940 = vmatpush1.bf16.msra.mxu1 %v1404_v25 }
  0x92   :  { %1022 = vmatpush1.bf16.msra.mxu0 %v1407_v26 }
  0x94   :  { %942 = vmatmul.mubr.bf16.vlgmr.msra.gmra.mrb[0].mxu1 %v82_v27 }
  0x95   :  { %1024 = vmatmul.mubr.bf16.vlgmr.msra.gmra.mrb[0].mxu0 %v86_v28 }
 0x167   :  { %v943_v34 = vpop.f32.mrb[0].mxu1 }
 0x168   :  { %v1025_v35 = vpop.f32.mrb[0].mxu0  ;;  %v1199_v14 = vadd.f32 %v943_v34, %v221_v32  ;;  %v945_v36 = vpop.f32.mrb[1].mxu1 }
 0x169   :  { %v1027_v37 = vpop.f32.mrb[1].mxu0  ;;  %v1201_v15 = vadd.f32 %v945_v36, %v225_v33  ;;  %v947_v38 = vpop.f32.mrb[2].mxu1 }
 0x16a   :  { %v1029_v39 = vpop.f32.mrb[2].mxu0  ;;  %v1200_v40 = vadd.f32 %v1199_v14, %v1025_v35  ;;  %v948_v41 = vpop.f32.mrb[3].mxu1 }
 0x16b   :  { %v1030_v42 = vpop.f32.mrb[3].mxu0  ;;  %v1202_v44 = vadd.f32 %v1201_v15, %v1027_v37 }
 0x16d   :  { %v1034_v45 = vcombine.low %v1200_v40, %v1202_v44  ;;  %v1044_v46 = vmul.f32 0.5, %v1202_v44 }
 0x16f   :  { %1198 = vst.sshfl [vmem:[%s1561_s4] sm:$0x33 pattern:$0x76325410] %v1034_v45  ;;  %v1045_v43 = vmul.f32 1.442695, %v1044_v46 }
 0x171   :  { %1410 = vpow2.f32 %v1045_v43 }
 0x17b   :  { %v1411_v48 = vpop.eup %1410 }
 0x17c   :  { %v1048_v49 = vmul.f32 %v1411_v48, %v1047_v47 }
 0x17e   :  { %v1049_v50 = vadd.f32 %v1200_v40, %v1048_v49 }
 0x180   :  { %1050 = vst [vmem:[#allocation5] sm:$0x3] %v1049_v50 }
 0x181   :  { %1445 = shalt.err (!%p1442_p12)
}
 0x182   :  { %s1446_s18 = scalar_lea.hbm %s1562_s5, 32 }
 0x183   :  { %p1447_p13 = scmp.ne.s32.totalorder %s1562_s5, %s1446_s18  ;;  %p1450_p0 = scmp.lt.u32.totalorder %s1446_s18, %s1562_s5 }
 0x185   :  { %p1452_p1 = pnand %p1450_p0, %p1447_p13 }
 0x187   :  { %1455 = shalt.err (!%p1452_p1)
}
 0x188   :  { %1062 = dma.vmem_to_hbm [thread:$0]  %s1060_s15, 32, %s1562_s5, [#allocation4]  }
 0x189   :  { %1458 = dma.done.wait [#allocation4], 32  }
 0x18a   :  { %1459 = vsyncadd [#allocation4], 4294967264 }
 0x18b   :  { %1068 = vsyncpa [#allocation3], 1 }
 0x18c   :  { %1069 = vsyncpa [#allocation4], 1 }

</bundles_post_ra>
